<compile_context>
chip_gen: v7x
topology: tpu7x:2x2x1
jax: 0.10.0
libtpu: 0.0.40
codegen_flags: <defaults>
</compile_context>

<pallas_src>
import numpy as np
import jax
import jax.numpy as jnp
from jax.experimental import pallas as pl
from jax.experimental.pallas import tpu as pltpu

EPS = 1e-5  # nn.BatchNorm2d default eps


# ----------------------------------------------------------------------------
# Pallas kernel: fused (C2,K)@(K,tm) matmul + BN bias + SiLU   (scale pre-folded)
# ----------------------------------------------------------------------------
def _focus_conv_kernel(w_ref, b_ref, x_ref, o_ref):
    # bf16 x bf16 -> f32 accumulate on the MXU; lane dim = tm (large, 128-aligned)
    y = jnp.dot(w_ref[...], x_ref[...], preferred_element_type=jnp.float32)  # (C2, tm)
    y = y + b_ref[...]                                   # (C2, 1) broadcast over lanes
    # SiLU: y * sigmoid(y) = y * 1/(1 + exp(-y)); exp + approx-reciprocal stay on EUP
    o_ref[...] = (y * pl.reciprocal(1.0 + jnp.exp(-y), approx=True)).astype(o_ref.dtype)


# ----------------------------------------------------------------------------
# Wrapper
# ----------------------------------------------------------------------------
def focus_forward(x_nchw, w, bn_scale, bn_bias, *,
                  out_dtype=jnp.float32, vmem_budget_bytes=8 << 20):
    """x_nchw: (N, C1, H, W).  w: (4*C1, C2).  bn_scale/bias: (C2,) folded BN.

    out_dtype=jnp.bfloat16 halves output HBM writeback if the consumer is bf16.
    """
    N, C1, H, W = x_nchw.shape
    assert H % 2 == 0 and W % 2 == 0
    Ho, Wo = H // 2, W // 2
    K = 4 * C1
    C2 = w.shape[1]
    M = Ho * Wo                                           # per-sample pixel count

    # Cast first (half the bytes materialized), then fold space-to-depth and the
    # "x^T" layout into one transpose: (N, K, Ho*Wo), K ordered (dc, dr, c) to match
    # torch.cat([::2,::2], [1::2,::2], [::2,1::2], [1::2,1::2]) channel order.
    xr = x_nchw.astype(jnp.bfloat16).reshape(N, C1, Ho, 2, Wo, 2)   # (N, c, h, dr, w, dc)
    xr = jnp.transpose(xr, (0, 5, 3, 1, 2, 4))                      # (N, dc, dr, c, h, w)
    x_t = xr.reshape(N, K, M)

    # Fold BN scale into the (tiny) weight; transpose for the lane-dense GEMM.
    w_t = (w.astype(jnp.float32) * bn_scale[None, :]).T.astype(jnp.bfloat16)  # (C2, K)
    b2d = bn_bias.reshape(C2, 1).astype(jnp.float32)                          # (C2, 1)

    # VMEM-budgeted lane tile (double-buffered x + out per column), 128-aligned.
    out_itemsize = np.dtype(out_dtype).itemsize
    bytes_per_col = 2 * (K * 2 + C2 * out_itemsize)
    tm = max(128, min(8192, vmem_budget_bytes // bytes_per_col))
    if tm >= M:
        tm, grid_m = M, 1                                  # single full-extent block
    else:
        tm = (tm // 128) * 128
        grid_m = pl.cdiv(M, tm)                            # boundary block masked by Pallas

    out = pl.pallas_call(
        _focus_conv_kernel,
        out_shape=jax.ShapeDtypeStruct((N, C2, M), out_dtype),
        grid_spec=pltpu.PrefetchScalarGridSpec(
            num_scalar_prefetch=0,
            grid=(N, grid_m),
            in_specs=[
                pl.BlockSpec((C2, K), lambda n, i: (0, 0)),          # weight (resident)
                pl.BlockSpec((C2, 1), lambda n, i: (0, 0)),          # BN bias (resident)
                pl.BlockSpec((None, K, tm), lambda n, i: (n, 0, i)),  # activations
            ],
            out_specs=pl.BlockSpec((None, C2, tm), lambda n, i: (n, 0, i)),
        ),
        compiler_params=pltpu.CompilerParams(
            # both axes independent -> megacore sharding on v7x; no-op on v5e/v6e.
            dimension_semantics=("parallel", "parallel"),
            # no vmem_limit override: tiles fit the 32 MiB scoped default everywhere.
        ),
    )(w_t, b2d, x_t)

    # (N, C2, M) is already NCHW up to a free reshape — no output transpose pass.
    return out.reshape(N, C2, Ho, Wo)


# ----------------------------------------------------------------------------
# Param helpers + pure-JAX reference (f32, PyTorch-literal slicing)
# ----------------------------------------------------------------------------
def bn_fuse(gamma, beta, mean, var, eps=EPS):
    scale = gamma / jnp.sqrt(var + eps)
    return scale, beta - mean * scale


def init_params(key, c1, c2):
    k = jax.random.split(key, 5)
    w = jax.random.normal(k[0], (4 * c1, c2), jnp.float32) * 0.1     # (K, C2)
    gamma = jax.random.uniform(k[1], (c2,), jnp.float32, 0.5, 1.5)
    beta = jax.random.normal(k[2], (c2,), jnp.float32) * 0.1
    mean = jax.random.normal(k[3], (c2,), jnp.float32) * 0.1
    var = jax.random.uniform(k[4], (c2,), jnp.float32, 0.5, 1.5)
    scale, bias = bn_fuse(gamma, beta, mean, var)
    return w, scale, bias


def reference_forward(x_nchw, w, bn_scale, bn_bias):
    a = x_nchw[..., ::2, ::2]
    b = x_nchw[..., 1::2, ::2]
    c = x_nchw[..., ::2, 1::2]
    d = x_nchw[..., 1::2, 1::2]
    xc = jnp.concatenate([a, b, c, d], axis=1).astype(jnp.float32)   # (N, 4*C1, Ho, Wo)
    y = jnp.einsum("nkhw,kc->nchw", xc, w)
    y = y * bn_scale[None, :, None, None] + bn_bias[None, :, None, None]
    return y * jax.nn.sigmoid(y)


if __name__ == "__main__":
    key = jax.random.PRNGKey(0)
    kx, kp = jax.random.split(key)

    N, C1, H, W = 2, 4, 16, 16   # NCHW input, as in PyTorch
    C2 = 8
    x = jax.random.normal(kx, (N, C1, H, W), jnp.float32)
    w, bn_scale, bn_bias = init_params(kp, C1, C2)

    out = jax.block_until_ready(focus_forward(x, w, bn_scale, bn_bias))
    ref = reference_forward(x, w, bn_scale, bn_bias)

    assert out.shape == (N, C2, H // 2, W // 2), out.shape
    # bf16 MXU inputs + approx reciprocal -> slightly looser tolerance than pure f32
    assert bool(jnp.allclose(out, ref, atol=2e-2, rtol=2e-2)), \
        float(jnp.max(jnp.abs(out - ref)))
    print("KERNEL_OK")
</pallas_src>

<mosaic_0001>
module attributes {stable_mosaic.version = 11 : i64} {
  func.func @_focus_conv_kernel(%arg0: i32, %arg1: i32, %arg2: memref<8x16xbf16, #tpu.memory_space<vmem>>, %arg3: memref<8x1xf32, #tpu.memory_space<vmem>>, %arg4: memref<1x16x64xbf16, #tpu.memory_space<vmem>>, %arg5: memref<1x8x64xf32, #tpu.memory_space<vmem>>) attributes {dimension_semantics = [#tpu.dimension_semantics<parallel>, #tpu.dimension_semantics<parallel>], iteration_bounds = array<i64: 2, 1>, scalar_prefetch = 0 : i64, scratch_operands = 0 : i64, tpu.core_type = #tpu.core_type<tc>, window_params = [{pipeline_mode = #tpu.pipeline_mode<synchronous>, transform_indices = @transform_0, window_bounds = array<i64: 8, 16>}, {pipeline_mode = #tpu.pipeline_mode<synchronous>, transform_indices = @transform_1, window_bounds = array<i64: 8, 1>}, {transform_indices = @transform_2, window_bounds = array<i64: 1, 16, 64>}, {transform_indices = @transform_3, window_bounds = array<i64: 1, 8, 64>}]} {
    %c0 = arith.constant 0 : index
    %c0_0 = arith.constant 0 : index
    %0 = vector.load %arg2[%c0, %c0_0] : memref<8x16xbf16, #tpu.memory_space<vmem>>, vector<8x16xbf16>
    %c0_1 = arith.constant 0 : index
    %c0_2 = arith.constant 0 : index
    %c0_3 = arith.constant 0 : index
    %1 = vector.load %arg4[%c0_1, %c0_2, %c0_3] : memref<1x16x64xbf16, #tpu.memory_space<vmem>>, vector<1x16x64xbf16>
    %2 = vector.shape_cast %1 : vector<1x16x64xbf16> to vector<16x64xbf16>
    %cst = arith.constant dense<0.000000e+00> : vector<8x64xf32>
    %3 = tpu.matmul %0, %2, %cst {dimension_numbers = #tpu.dot_dimension_numbers<[1], [0], [0], [1], [0, 0, 1, 1], [], []>} : vector<8x16xbf16>, vector<16x64xbf16>, vector<8x64xf32> -> vector<8x64xf32>
    %c0_4 = arith.constant 0 : index
    %c0_5 = arith.constant 0 : index
    %4 = vector.load %arg3[%c0_4, %c0_5] : memref<8x1xf32, #tpu.memory_space<vmem>>, vector<8x1xf32>
    %5 = vector.broadcast %4 : vector<8x1xf32> to vector<8x64xf32>
    %6 = arith.addf %3, %5 : vector<8x64xf32>
    %cst_6 = arith.constant 0.000000e+00 : f32
    %7 = vector.broadcast %cst_6 : f32 to vector<8x64xf32>
    %8 = arith.subf %7, %6 : vector<8x64xf32>
    %9 = math.exp %8 : vector<8x64xf32>
    %cst_7 = arith.constant 1.000000e+00 : f32
    %10 = vector.broadcast %cst_7 : f32 to vector<8x64xf32>
    %11 = arith.addf %10, %9 : vector<8x64xf32>
    %12 = tpu.reciprocal %11 {approx = true} : vector<8x64xf32> -> vector<8x64xf32>
    %13 = arith.mulf %6, %12 : vector<8x64xf32>
    %c0_8 = arith.constant 0 : index
    %c0_9 = arith.constant 0 : index
    %c0_10 = arith.constant 0 : index
    %14 = vector.load %arg5[%c0_8, %c0_9, %c0_10] : memref<1x8x64xf32, #tpu.memory_space<vmem>>, vector<1x8x64xf32>
    %15 = vector.shape_cast %14 : vector<1x8x64xf32> to vector<8x64xf32>
    %16 = vector.shape_cast %13 : vector<8x64xf32> to vector<1x8x64xf32>
    tpu.vector_store %arg5[%c0_8, %c0_9, %c0_10], %16 {strides = array<i32>} : memref<1x8x64xf32, #tpu.memory_space<vmem>>, vector<1x8x64xf32>,
    return
  }
  func.func @transform_0(%arg0: i32, %arg1: i32) -> (i32, i32) {
    %c0_i32 = arith.constant 0 : i32
    %c0_i32_0 = arith.constant 0 : i32
    %c0_i32_1 = arith.constant 0 : i32
    return %c0_i32, %c0_i32_0 : i32, i32
  }
  func.func @transform_1(%arg0: i32, %arg1: i32) -> (i32, i32) {
    %c0_i32 = arith.constant 0 : i32
    %c0_i32_0 = arith.constant 0 : i32
    %c0_i32_1 = arith.constant 0 : i32
    return %c0_i32, %c0_i32_0 : i32, i32
  }
  func.func @transform_2(%arg0: i32, %arg1: i32) -> (i32, i32, i32) {
    %c0_i32 = arith.constant 0 : i32
    %c0_i32_0 = arith.constant 0 : i32
    return %arg0, %c0_i32, %arg1 : i32, i32, i32
  }
  func.func @transform_3(%arg0: i32, %arg1: i32) -> (i32, i32, i32) {
    %c0_i32 = arith.constant 0 : i32
    %c0_i32_0 = arith.constant 0 : i32
    return %arg0, %c0_i32, %arg1 : i32, i32, i32
  }
}

</mosaic_0001>

<bundles_post_ra>
// kernel: tpu_custom_call.1
= control target key start
LH: loop header
LB: loop body
LE: loop exit
PB: predicated region body
PF: predicated region fallthrough
CT: control target
= control target key end

     0   :  { %8 = vsyncpa [#allocation3], 0  ;;  %s766_s0 = inlined_call_operand.hbm [shape: bf16[8,16], index: 0, kind: input, shape index: {}]   ;;  %s767_s1 = inlined_call_operand.vmem [shape: f32[8,1], index: 1, kind: input, shape index: {}]   ;;  %s768_s2 = inlined_call_operand.vmem [shape: bf16[2,16,64], index: 2, kind: input, shape index: {}]   ;;  %s769_s3 = inlined_call_operand.hbm [shape: f32[2,8,64], index: 3, kind: output, shape index: {}]  }
   0x1   :  { %9 = vsyncpa [#allocation4], 0 }
   0x2   :  { %11 = vsyncpa [#allocation4 + $0x1], 0  ;;  %s613_s12 = smov 0   ;;  %s615_s13 = smov 0  }
   0x3   :  { %s617_s14 = smov 0   ;;  %s619_s15 = smov 0  }
   0x4   :  { %s621_s16 = smov 0   ;;  %s623_s17 = smov 0  }
   0x5 LB: > { %s376_s18 = sadd.s32 4294967295, %s586_s17   ;;  %s377_s19 = sadd.s32 4294967294, %s586_s17   ;;  %s586_s17 = sphi %s623_s17, %s17_s17   ;;  %s582_s16 = sphi %s621_s16, %s787_s16   ;;  %s578_s15 = sphi %s619_s15, %s786_s15   ;;  %s574_s14 = sphi %s617_s14, %s785_s14   ;;  %s570_s13 = sphi %s615_s13, %s784_s13   ;;  %s566_s12 = sphi %s613_s12, %s783_s12  }
   0x6   : > { %s29_s20 = sadd.s32 1, %s582_s16  ;;  %s108_s21 = sadd.s32 1, %s574_s14 }
   0x7   : > { %p31_p0 = scmp.ge.s32.totalorder %s29_s20, 2  ;;  %p118_p1 = scmp.ne.s32.totalorder %s574_s14, %s570_s13 }
   0x8   : > { %p119_p2 = scmp.eq.s32.totalorder %s376_s18, 1  ;;  %p124_p3 = scmp.ne.s32.totalorder %s570_s13, %s566_s12 }
   0x9   : > { %s789_s20 = smov (%p31_p0, %s29_s20), 0  ;;  %p125_p5 = scmp.eq.s32.totalorder %s377_s19, 1 }
   0xa   : > { %p653_p4 = por %p119_p2, %p118_p1  ;;  %s103_s23 = ssub.s32 %s582_s16, %s789_s20 }
   0xb   : > { %p378_p6 = scmp.ge.s32.totalorder %s586_s17, 1  ;;  %p106_p7 = scmp.eq.s32.totalorder %s103_s23, 0 }
   0xc   : > { %s774_s22 = scalar_select %p653_p4, 1, 0 }
   0xd   : > { %p660_p8 = por %p125_p5, %p124_p3  ;;  %p132_p9 = scmp.lt.s32.totalorder %s586_s17, 3 }
   0xe   : > { %s666_s25 = scalar_select %p106_p7, %s574_s14, %s108_s21  }
   0xf   : > { %s775_s24 = scalar_select %p660_p8, 1, 0 }
  0x10   : > { %p668_p10 = pnand %p378_p6, %p132_p9  ;;  %p672_p11 = scmp.eq.s32.totalorder %s376_s18, 0 }
  0x11   : > { %s588_s28 = smov [#allocation2]   ;;  %s476_s6 = scalar_lea.hbm %s766_s0, 64 }
  0x12   : > { %s776_s26 = scalar_select %p668_p10, 1, 0 }
  0x13   : > { %s777_s27 = scalar_select %p672_p11, 1, 0 }
  0x14   : > { %p407_p12 = pneg %p668_p10  ;;  %s145_s29 = sshll.u32 %s588_s28, 4  ;;  %s146_s29 = int_to_ptr.vmem [resolvable:$true] %s145_s29 }
  0x15   : > { %p477_p0 = scmp.ne.s32.totalorder %s766_s0, %s476_s6  ;;  %p483_p5 = scmp.lt.u32.totalorder %s476_s6, %s766_s0 }
  0x16   : > { %p680_p13 = pnand %p672_p11, %p407_p12 }
  0x18   : > { %p478_p1 = pneg %p680_p13 }
  0x1a   : > { %p479_p2 = pnand %p478_p1, %p477_p0 }
  0x1c   : > { %p480_p3 = pneg %p479_p2 }
  0x1e   : > { %p485_p6 = pnand %p483_p5, %p480_p3 }
  0x20   : > { %488 = shalt.err (!%p485_p6)
}
  0x21   : > { %s489_s11 = scalar_lea.vmem %s146_s29, 64  ;;  %p497_p8 = scmp.lt.s32.totalorder %s146_s29, %s146_s29 }
  0x22   : > { %p490_p7 = scmp.ne.s32.totalorder %s146_s29, %s489_s11  ;;  %p498_p4 = scmp.lt.s32.totalorder %s489_s11, %s489_s11 }
  0x24   : > { %p492_p9 = pnand %p490_p7, %p478_p1  ;;  %p499_p11 = por %p498_p4, %p497_p8 }
  0x26   : > { %p493_p12 = pneg %p492_p9 }
  0x28   : > { %p500_p10 = pnand %p499_p11, %p493_p12 }
  0x2a   : > { %503 = shalt.err (!%p500_p10)
}
  0x2b   : > { %410 = dma.hbm_to_vmem [thread:$0]  (!%p680_p13), %s766_s0, 64, %s146_s29, [#allocation3]  }
  0x2c   : > { %p779_p0 = scmp.ne.s32.totalorder %s776_s26, 0 }
  0x2d   : > { %p780_p2 = scmp.ne.s32.totalorder (!%p779_p0), %s777_s27, 0 }
  0x2e   : > { %172 = sbr.rel (%p779_p0) target bundleno = 322 (0x142), region = 32 }
  0x35   : > { %557 = dma.done.wait (%p780_p2), [#allocation3], 64  }
  0x36   : > { %559 = vsyncadd (%p780_p2), [#allocation3], 4294967232  ;;  %p199_p4 = scmp.lt.s32.totalorder %s578_s15, 1  ;;  %v589_v0 = vmov 0.0   ;;  %vm590_vm0 = vmmov 0   ;;  %v591_v1 = vmov 0  }
  0x37   : > { %395 = vmatprep.subr.bf16.mxu0 %v589_v0  ;;  %397 = vmatprep.mubr.msk.bf16.mxu0 %vm590_vm0, %v589_v0  ;;  %v211_v3 = vld [vmem:[%s767_s1] sm:$0xff]  ;;  %vm223_vm1 = vcmask 130048   ;;  %s196_s27 = sand.u32 1, %s570_s13   ;;  %s389_s6 = sshll.u32 %s578_s15, 7  ;;  %vm273_vm2 = vcmask 523264  }
  0x38   : > { %s200_s21 = scalar_select %p199_p4, %s578_s15, 1  ;;  %470 = vset.pattern.permute.xlu0 %v591_v1  ;;  %v208_v4 = vld [vmem:[#allocation2] sm:$0xf] }
  0x39   : > { %214 = vperm.xlu0 %470, %v211_v3   ;;  %s383_s5 = sshll.u32 %s196_s27, 3  ;;  %s719_s11 = scalar_lea.hbm %s769_s3, %s389_s6 }
  0x3a   : > { %s392_s23 = sshll.u32 %s200_s21, 3  ;;  %s198_s7 = scalar_lea.vmem [#allocation5], %s383_s5 }
  0x3b   : > { %s206_s29 = scalar_lea.vmem %s768_s2, %s392_s23  ;;  %s290_s8 = sshll.u32 %s198_s7, 4  ;;  %s721_s8 = int_to_ptr.vmem [resolvable:$true] %s290_s8 }
  0x3c   : > { %v471_v2 = vld [vmem:[%s206_s29] sm:$0xff]   ;;  %s276_s18 = scalar_lea.sflag [#allocation4], %s196_s27  ;;  %s504_s19 = scalar_lea.vmem %s721_s8, 128 }
  0x3d   : > { %396 = vmatpush3.bf16.msra.mxu0 %v471_v2  ;;  %p505_p8 = scmp.ne.s32.totalorder %s721_s8, %s504_s19  ;;  %p781_p10 = scmp.ne.s32.totalorder %s774_s22, 0 }
  0x3e   : > { %s592_s15 = smov [#allocation5]  }
  0x3f   : > { %p506_p11 = pnand %p505_p8, %p781_p10  ;;  %s508_s21 = sshll.u32 %s592_s15, 4  ;;  %s509_s21 = int_to_ptr.vmem [resolvable:$false] %s508_s21 }
  0x40   : > { %398 = vmatmul.mubr.msk.bf16.vlgmr.msra.gmra.mrb[0].mxu0 %vm223_vm1, %v208_v4  ;;  %s510_s23 = scalar_lea.vmem %s509_s21, 256  ;;  %p511_p1 = scmp.lt.s32.totalorder %s721_s8, %s509_s21 }
  0x41   : > { %p507_p13 = pneg %p506_p11  ;;  %p512_p3 = scmp.lt.s32.totalorder %s510_s23, %s504_s19 }
  0x43   : > { %p513_p5 = por %p512_p3, %p511_p1 }
  0x45   : > { %p514_p6 = pnand %p513_p5, %p507_p13 }
  0xb8   : > { %v215_v5 = vpop.permute.xlu0 %214 }
 0x113   : > { %v261_v6 = vpop.f32.mrb[0].mxu0 }
 0x114   : > { %v262_v7 = vadd.f32 %v261_v6, %v215_v5  ;;  %v399_v8 = vpop.f32.mrb[1].mxu0 }
 0x115   : > { %v264_v9 = vpop.f32.mrb[2].mxu0 }
 0x116   : > { %v267_v10 = vsub.f32 0.0, %v262_v7  ;;  %v400_v11 = vpop.f32.mrb[3].mxu0 }
 0x118   : > { %v268_v12 = vmul.f32 1.442695, %v267_v10 }
 0x11a   : > { %472 = vpow2.f32 %v268_v12 }
 0x124   : > { %v473_v13 = vpop.eup %472 }
 0x125   : > { %v270_v14 = vadd.f32 1.0, %v473_v13 }
 0x127   : > { %474 = vrcp.f32 %v270_v14 }
 0x131   : > { %v475_v15 = vpop.eup %474 }
 0x132   : > { %v272_v16 = vmul.f32 %v475_v15, %v262_v7 }
 0x134   : > { %274 = vst.msk [vmem:[%s198_s7] sm:$0xff] %vm273_vm2, %v272_v16 }
 0x135   : > { %517 = shalt.err (!%p514_p6)
}
 0x136   : > { %s518_s28 = scalar_lea.hbm %s719_s11, 128  ;;  %s522_s30 = scalar_lea.hbm %s769_s3, 256 }
 0x137   : > { %p519_p7 = scmp.ne.s32.totalorder %s719_s11, %s518_s28  ;;  %p523_p0 = scmp.lt.u32.totalorder %s719_s11, %s769_s3 }
 0x138   : > { %p524_p2 = scmp.lt.u32.totalorder %s522_s30, %s518_s28  ;;  %p526_p8 = scmp.lt.u32.totalorder %s518_s28, %s719_s11 }
 0x139   : > { %p520_p9 = pnand %p519_p7, %p781_p10 }
 0x13a   : > { %p525_p4 = por %p524_p2, %p523_p0 }
 0x13b   : > { %p521_p12 = pneg %p520_p9 }
 0x13c   : > { %p527_p11 = por %p526_p8, %p525_p4 }
 0x13e   : > { %p528_p13 = pnand %p527_p11, %p521_p12 }
 0x140   : > { %531 = shalt.err (!%p528_p13)
}
 0x141   : > { %405 = dma.vmem_to_hbm [thread:$0]  (%p781_p10), %s721_s8, 128, %s719_s11, %s276_s18  }
 0x142 PF: > { %p417_p1 = scmp.ge.s32.totalorder %s586_s17, 2  ;;  %s302_s5 = sand.u32 1, %s566_s12  }
 0x143   : > { %p782_p3 = scmp.ne.s32.totalorder %s775_s24, 0  ;;  %s303_s6 = scalar_lea.sflag [#allocation4], %s302_s5 }
 0x145   : > { %p412_p5 = pnand %p417_p1, %p782_p3 }
 0x147   : > { %561 = dma.done.wait (!%p412_p5), %s303_s6, 128  }
 0x148   : > { %563 = vsyncadd (!%p412_p5), %s303_s6, 4294967168  ;;  %s17_s17 = sadd.s32 1, %s586_s17   ;;  %s783_s12 = smov %s570_s13 }
 0x149   : > { %p14_p6 = scmp.ge.s32.totalorder %s17_s17, 4   ;;  %s784_s13 = smov %s574_s14 }
 0x14a   : > { %s785_s14 = smov %s666_s25  ;;  %s786_s15 = smov %s582_s16 }
 0x14b   : > { %s787_s16 = smov %s789_s20  ;;  %16 = sbr.rel (!%p14_p6) target bundleno = 5 (0x5), region = 72 }
 0x152   :  { %308 = vsyncpa [#allocation3], 1 }
 0x153   :  { %310 = vsyncpa [#allocation3 + $0x1], 1 }
 0x154   :  { %311 = vsyncpa [#allocation4], 1 }
 0x155   :  { %313 = vsyncpa [#allocation4 + $0x1], 1 }

</bundles_post_ra>
